<compile_context>
chip_gen: v7x
topology: tpu7x:2x2x1
jax: 0.10.0
libtpu: 0.0.40
codegen_flags: <defaults>
</compile_context>

<pallas_src>
import math

import jax
import jax.numpy as jnp
from jax.experimental import pallas as pl
from jax.experimental.pallas import tpu as pltpu

F_PAD = 128  # every layer width (9,16,64,128,64,32,1) padded to 128 lanes


# -----------------------------------------------------------------------------
# Kernel: fused chain of 6 (matmul + bias) layers, all operands VMEM-resident.
# x_ref: (TB, 128)  w_ref: (L, 128, 128)  b_ref: (L, 1, 128)  o_ref: (TB, 128)
# -----------------------------------------------------------------------------
def bp_mlp_kernel(x_ref, w_ref, b_ref, o_ref):
    h = x_ref[...]
    n_layers = w_ref.shape[0]
    for i in range(n_layers):  # static unroll; all slices are compile-time
        h = jnp.dot(h, w_ref[i], preferred_element_type=jnp.float32) + b_ref[i]
    o_ref[...] = h


# -----------------------------------------------------------------------------
# One-time packing of the per-layer (W_(in,out), b_(1,out)) params into two
# zero-padded lane-dense slabs.  Do this once if weights are static.
# -----------------------------------------------------------------------------
def pack_params(params):
    n_layers = len(params)
    w_slab = jnp.zeros((n_layers, F_PAD, F_PAD), jnp.float32)
    b_slab = jnp.zeros((n_layers, 1, F_PAD), jnp.float32)
    for i, (w, b) in enumerate(params):
        fi, fo = w.shape
        w_slab = w_slab.at[i, :fi, :fo].set(w.astype(jnp.float32))
        b_slab = b_slab.at[i, :, :fo].set(b.astype(jnp.float32))
    return w_slab, b_slab


def _round_up(x, m):
    return ((x + m - 1) // m) * m


def bp_module_forward(x, w_slab, b_slab, in_features, out_features,
                      *, row_tile=256):
    """x: (B, in_features) f32 -> (B, out_features) f32."""
    B = x.shape[0]
    n_layers = w_slab.shape[0]

    # Row tile: multiple of 8 sublanes; small batches -> single grid step.
    tb = min(row_tile, _round_up(B, 8))
    b_pad = _round_up(B, tb)

    # Pad input to a lane-dense (b_pad, 128) slab (exact: padded lanes are 0).
    x_pad = jnp.zeros((b_pad, F_PAD), jnp.float32).at[:B, :in_features].set(x)

    grid = (b_pad // tb,)
    out = pl.pallas_call(
        bp_mlp_kernel,
        out_shape=jax.ShapeDtypeStruct((b_pad, F_PAD), jnp.float32),
        grid_spec=pltpu.PrefetchScalarGridSpec(
            num_scalar_prefetch=0,
            grid=grid,
            in_specs=[
                pl.BlockSpec((tb, F_PAD), lambda i: (i, 0)),
                # Weights/biases: same block every step -> stay VMEM-resident.
                pl.BlockSpec((n_layers, F_PAD, F_PAD), lambda i: (0, 0, 0)),
                pl.BlockSpec((n_layers, 1, F_PAD), lambda i: (0, 0, 0)),
            ],
            out_specs=pl.BlockSpec((tb, F_PAD), lambda i: (i, 0)),
        ),
        compiler_params=pltpu.CompilerParams(
            dimension_semantics=("parallel",)),
    )(x_pad, w_slab, b_slab)

    return out[:B, :out_features]


# -----------------------------------------------------------------------------
# Deterministic parameter init (mirrors torch.nn.Linear default: U[-k, k],
# k = 1/sqrt(fan_in)), weights already transposed to (in, out).
# -----------------------------------------------------------------------------
def init_params(key, layer_dims):
    params = []
    for (fan_in, fan_out) in layer_dims:
        key, kw, kb = jax.random.split(key, 3)
        bound = 1.0 / math.sqrt(fan_in)
        w = jax.random.uniform(kw, (fan_in, fan_out), jnp.float32, -bound, bound)
        b = jax.random.uniform(kb, (1, fan_out), jnp.float32, -bound, bound)
        params.append((w, b))
    return params


def reference_forward(x, params):
    h = x
    for w, b in params:
        h = h @ w + b
    return h


if __name__ == "__main__":
    input_size = 9
    output_size = 1
    batch = 8

    # Layer sizes from BPModule.__init__:
    # linear1: 9->16, bp1: 16->64, bp2: 64->128, bp3: 128->64,
    # linear2: 64->32, linear3: 32->1
    layer_dims = [
        (input_size, 16),
        (16, 64),
        (64, 128),
        (128, 64),
        (64, 32),
        (32, output_size),
    ]

    key = jax.random.PRNGKey(0)
    key, kx = jax.random.split(key)
    x = jax.random.normal(kx, (batch, input_size), jnp.float32)
    params = init_params(key, layer_dims)

    # Pack once (weights are static across calls).
    w_slab, b_slab = pack_params(params)
    w_slab, b_slab = jax.block_until_ready((w_slab, b_slab))

    out = bp_module_forward(x, w_slab, b_slab, input_size, output_size)
    out = jax.block_until_ready(out)

    ref = reference_forward(x, params)
    assert out.shape == (batch, output_size)
    assert jnp.allclose(out, ref, atol=1e-4, rtol=1e-4)

    print("KERNEL_OK")
</pallas_src>

<mosaic_0001>
module attributes {stable_mosaic.version = 11 : i64} {
  func.func @bp_mlp_kernel(%arg0: i32, %arg1: memref<8x128xf32, #tpu.memory_space<vmem>>, %arg2: memref<6x128x128xf32, #tpu.memory_space<vmem>>, %arg3: memref<6x1x128xf32, #tpu.memory_space<vmem>>, %arg4: memref<8x128xf32, #tpu.memory_space<vmem>>) attributes {dimension_semantics = [#tpu.dimension_semantics<parallel>], iteration_bounds = array<i64: 1>, scalar_prefetch = 0 : i64, scratch_operands = 0 : i64, tpu.core_type = #tpu.core_type<tc>, window_params = [{transform_indices = @transform_0, window_bounds = array<i64: 8, 128>}, {pipeline_mode = #tpu.pipeline_mode<synchronous>, transform_indices = @transform_1, window_bounds = array<i64: 6, 128, 128>}, {pipeline_mode = #tpu.pipeline_mode<synchronous>, transform_indices = @transform_2, window_bounds = array<i64: 6, 1, 128>}, {transform_indices = @transform_3, window_bounds = array<i64: 8, 128>}]} {
    %c0 = arith.constant 0 : index
    %c0_0 = arith.constant 0 : index
    %0 = vector.load %arg1[%c0, %c0_0] : memref<8x128xf32, #tpu.memory_space<vmem>>, vector<8x128xf32>
    %c0_1 = arith.constant 0 : index
    %c0_2 = arith.constant 0 : index
    %c0_3 = arith.constant 0 : index
    %1 = vector.load %arg2[%c0_1, %c0_2, %c0_3] : memref<6x128x128xf32, #tpu.memory_space<vmem>>, vector<1x128x128xf32>
    %2 = vector.shape_cast %1 : vector<1x128x128xf32> to vector<128x128xf32>
    %cst = arith.constant dense<0.000000e+00> : vector<8x128xf32>
    %3 = tpu.matmul %0, %2, %cst {dimension_numbers = #tpu.dot_dimension_numbers<[1], [0], [0], [1], [0, 0, 1, 1], [], []>} : vector<8x128xf32>, vector<128x128xf32>, vector<8x128xf32> -> vector<8x128xf32>
    %c0_4 = arith.constant 0 : index
    %c0_5 = arith.constant 0 : index
    %c0_6 = arith.constant 0 : index
    %4 = vector.load %arg3[%c0_4, %c0_5, %c0_6] : memref<6x1x128xf32, #tpu.memory_space<vmem>>, vector<1x1x128xf32>
    %5 = vector.shape_cast %4 : vector<1x1x128xf32> to vector<1x128xf32>
    %6 = vector.broadcast %5 : vector<1x128xf32> to vector<8x128xf32>
    %7 = arith.addf %3, %6 : vector<8x128xf32>
    %c1 = arith.constant 1 : index
    %c0_7 = arith.constant 0 : index
    %c0_8 = arith.constant 0 : index
    %8 = vector.load %arg2[%c1, %c0_7, %c0_8] : memref<6x128x128xf32, #tpu.memory_space<vmem>>, vector<1x128x128xf32>
    %9 = vector.shape_cast %8 : vector<1x128x128xf32> to vector<128x128xf32>
    %cst_9 = arith.constant dense<0.000000e+00> : vector<8x128xf32>
    %10 = tpu.matmul %7, %9, %cst_9 {dimension_numbers = #tpu.dot_dimension_numbers<[1], [0], [0], [1], [0, 0, 1, 1], [], []>} : vector<8x128xf32>, vector<128x128xf32>, vector<8x128xf32> -> vector<8x128xf32>
    %c1_10 = arith.constant 1 : index
    %c0_11 = arith.constant 0 : index
    %c0_12 = arith.constant 0 : index
    %11 = vector.load %arg3[%c1_10, %c0_11, %c0_12] : memref<6x1x128xf32, #tpu.memory_space<vmem>>, vector<1x1x128xf32>
    %12 = vector.shape_cast %11 : vector<1x1x128xf32> to vector<1x128xf32>
    %13 = vector.broadcast %12 : vector<1x128xf32> to vector<8x128xf32>
    %14 = arith.addf %10, %13 : vector<8x128xf32>
    %c2 = arith.constant 2 : index
    %c0_13 = arith.constant 0 : index
    %c0_14 = arith.constant 0 : index
    %15 = vector.load %arg2[%c2, %c0_13, %c0_14] : memref<6x128x128xf32, #tpu.memory_space<vmem>>, vector<1x128x128xf32>
    %16 = vector.shape_cast %15 : vector<1x128x128xf32> to vector<128x128xf32>
    %cst_15 = arith.constant dense<0.000000e+00> : vector<8x128xf32>
    %17 = tpu.matmul %14, %16, %cst_15 {dimension_numbers = #tpu.dot_dimension_numbers<[1], [0], [0], [1], [0, 0, 1, 1], [], []>} : vector<8x128xf32>, vector<128x128xf32>, vector<8x128xf32> -> vector<8x128xf32>
    %c2_16 = arith.constant 2 : index
    %c0_17 = arith.constant 0 : index
    %c0_18 = arith.constant 0 : index
    %18 = vector.load %arg3[%c2_16, %c0_17, %c0_18] : memref<6x1x128xf32, #tpu.memory_space<vmem>>, vector<1x1x128xf32>
    %19 = vector.shape_cast %18 : vector<1x1x128xf32> to vector<1x128xf32>
    %20 = vector.broadcast %19 : vector<1x128xf32> to vector<8x128xf32>
    %21 = arith.addf %17, %20 : vector<8x128xf32>
    %c3 = arith.constant 3 : index
    %c0_19 = arith.constant 0 : index
    %c0_20 = arith.constant 0 : index
    %22 = vector.load %arg2[%c3, %c0_19, %c0_20] : memref<6x128x128xf32, #tpu.memory_space<vmem>>, vector<1x128x128xf32>
    %23 = vector.shape_cast %22 : vector<1x128x128xf32> to vector<128x128xf32>
    %cst_21 = arith.constant dense<0.000000e+00> : vector<8x128xf32>
    %24 = tpu.matmul %21, %23, %cst_21 {dimension_numbers = #tpu.dot_dimension_numbers<[1], [0], [0], [1], [0, 0, 1, 1], [], []>} : vector<8x128xf32>, vector<128x128xf32>, vector<8x128xf32> -> vector<8x128xf32>
    %c3_22 = arith.constant 3 : index
    %c0_23 = arith.constant 0 : index
    %c0_24 = arith.constant 0 : index
    %25 = vector.load %arg3[%c3_22, %c0_23, %c0_24] : memref<6x1x128xf32, #tpu.memory_space<vmem>>, vector<1x1x128xf32>
    %26 = vector.shape_cast %25 : vector<1x1x128xf32> to vector<1x128xf32>
    %27 = vector.broadcast %26 : vector<1x128xf32> to vector<8x128xf32>
    %28 = arith.addf %24, %27 : vector<8x128xf32>
    %c4 = arith.constant 4 : index
    %c0_25 = arith.constant 0 : index
    %c0_26 = arith.constant 0 : index
    %29 = vector.load %arg2[%c4, %c0_25, %c0_26] : memref<6x128x128xf32, #tpu.memory_space<vmem>>, vector<1x128x128xf32>
    %30 = vector.shape_cast %29 : vector<1x128x128xf32> to vector<128x128xf32>
    %cst_27 = arith.constant dense<0.000000e+00> : vector<8x128xf32>
    %31 = tpu.matmul %28, %30, %cst_27 {dimension_numbers = #tpu.dot_dimension_numbers<[1], [0], [0], [1], [0, 0, 1, 1], [], []>} : vector<8x128xf32>, vector<128x128xf32>, vector<8x128xf32> -> vector<8x128xf32>
    %c4_28 = arith.constant 4 : index
    %c0_29 = arith.constant 0 : index
    %c0_30 = arith.constant 0 : index
    %32 = vector.load %arg3[%c4_28, %c0_29, %c0_30] : memref<6x1x128xf32, #tpu.memory_space<vmem>>, vector<1x1x128xf32>
    %33 = vector.shape_cast %32 : vector<1x1x128xf32> to vector<1x128xf32>
    %34 = vector.broadcast %33 : vector<1x128xf32> to vector<8x128xf32>
    %35 = arith.addf %31, %34 : vector<8x128xf32>
    %c5 = arith.constant 5 : index
    %c0_31 = arith.constant 0 : index
    %c0_32 = arith.constant 0 : index
    %36 = vector.load %arg2[%c5, %c0_31, %c0_32] : memref<6x128x128xf32, #tpu.memory_space<vmem>>, vector<1x128x128xf32>
    %37 = vector.shape_cast %36 : vector<1x128x128xf32> to vector<128x128xf32>
    %cst_33 = arith.constant dense<0.000000e+00> : vector<8x128xf32>
    %38 = tpu.matmul %35, %37, %cst_33 {dimension_numbers = #tpu.dot_dimension_numbers<[1], [0], [0], [1], [0, 0, 1, 1], [], []>} : vector<8x128xf32>, vector<128x128xf32>, vector<8x128xf32> -> vector<8x128xf32>
    %c5_34 = arith.constant 5 : index
    %c0_35 = arith.constant 0 : index
    %c0_36 = arith.constant 0 : index
    %39 = vector.load %arg3[%c5_34, %c0_35, %c0_36] : memref<6x1x128xf32, #tpu.memory_space<vmem>>, vector<1x1x128xf32>
    %40 = vector.shape_cast %39 : vector<1x1x128xf32> to vector<1x128xf32>
    %41 = vector.broadcast %40 : vector<1x128xf32> to vector<8x128xf32>
    %42 = arith.addf %38, %41 : vector<8x128xf32>
    %c0_37 = arith.constant 0 : index
    %c0_38 = arith.constant 0 : index
    %43 = vector.load %arg4[%c0_37, %c0_38] : memref<8x128xf32, #tpu.memory_space<vmem>>, vector<8x128xf32>
    tpu.vector_store %arg4[%c0_37, %c0_38], %42 {strides = array<i32>} : memref<8x128xf32, #tpu.memory_space<vmem>>, vector<8x128xf32>,
    return
  }
  func.func @transform_0(%arg0: i32) -> (i32, i32) {
    %c0_i32 = arith.constant 0 : i32
    %c0_i32_0 = arith.constant 0 : i32
    return %arg0, %c0_i32 : i32, i32
  }
  func.func @transform_1(%arg0: i32) -> (i32, i32, i32) {
    %c0_i32 = arith.constant 0 : i32
    %c0_i32_0 = arith.constant 0 : i32
    %c0_i32_1 = arith.constant 0 : i32
    %c0_i32_2 = arith.constant 0 : i32
    return %c0_i32, %c0_i32_0, %c0_i32_1 : i32, i32, i32
  }
  func.func @transform_2(%arg0: i32) -> (i32, i32, i32) {
    %c0_i32 = arith.constant 0 : i32
    %c0_i32_0 = arith.constant 0 : i32
    %c0_i32_1 = arith.constant 0 : i32
    %c0_i32_2 = arith.constant 0 : i32
    return %c0_i32, %c0_i32_0, %c0_i32_1 : i32, i32, i32
  }
  func.func @transform_3(%arg0: i32) -> (i32, i32) {
    %c0_i32 = arith.constant 0 : i32
    %c0_i32_0 = arith.constant 0 : i32
    return %arg0, %c0_i32 : i32, i32
  }
}

</mosaic_0001>

<bundles_post_ra>
// kernel: tpu_custom_call.1
= control target key start
LH: loop header
LB: loop body
LE: loop exit
PB: predicated region body
PF: predicated region fallthrough
CT: control target
= control target key end

     0   :  { %8 = vsyncpa [#allocation3], 0  ;;  %s1323_s0 = inlined_call_operand.hbm [shape: f32[8,128], index: 0, kind: input, shape index: {}]   ;;  %s1324_s1 = inlined_call_operand.hbm [shape: f32[6,128,128], index: 1, kind: input, shape index: {}]   ;;  %s1325_s2 = inlined_call_operand.vmem [shape: f32[6,1,128], index: 2, kind: input, shape index: {}]   ;;  %s1326_s3 = inlined_call_operand.hbm [shape: f32[8,128], index: 3, kind: output, shape index: {}]  }
   0x1   :  { %9 = vsyncpa [#allocation6], 0 }
   0x2   :  { %10 = vsyncpa [#allocation4], 0  ;;  %s1174_s12 = smov [#allocation2]   ;;  %s1175_s14 = smov [#allocation5]  }
   0x3   :  { %s17_s13 = sshll.u32 %s1174_s12, 4  ;;  %s26_s15 = sshll.u32 %s1175_s14, 4  ;;  %s18_s13 = int_to_ptr.vmem [resolvable:$true] %s17_s13  ;;  %s1202_s15 = int_to_ptr.vmem [resolvable:$true] %s26_s15 }
   0x4   :  { %s1102_s18 = scalar_lea.hbm %s1323_s0, 128 }
   0x5   :  { %p1103_p0 = scmp.ne.s32.totalorder %s1323_s0, %s1102_s18  ;;  %p1106_p1 = scmp.lt.u32.totalorder %s1102_s18, %s1323_s0 }
   0x7   :  { %p1108_p2 = pnand %p1106_p1, %p1103_p0 }
   0x9   :  { %1111 = shalt.err (!%p1108_p2)
}
   0xa   :  { %s1112_s23 = scalar_lea.vmem %s18_s13, 128  ;;  %p1117_p4 = scmp.lt.s32.totalorder %s18_s13, %s18_s13 }
   0xb   :  { %p1113_p3 = scmp.ne.s32.totalorder %s18_s13, %s1112_s23  ;;  %p1118_p5 = scmp.lt.s32.totalorder %s1112_s23, %s1112_s23 }
   0xd   :  { %p1119_p6 = por %p1118_p5, %p1117_p4 }
   0xf   :  { %p1120_p7 = pnand %p1119_p6, %p1113_p3 }
  0x11   :  { %1123 = shalt.err (!%p1120_p7)
}
  0x12   :  { %20 = dma.hbm_to_vmem [thread:$0]  %s1323_s0, 128, %s18_s13, [#allocation3]  }
  0x13   :  { %s1124_s28 = scalar_lea.hbm %s1324_s1, 12288 }
  0x14   :  { %p1125_p8 = scmp.ne.s32.totalorder %s1324_s1, %s1124_s28  ;;  %p1128_p9 = scmp.lt.u32.totalorder %s1124_s28, %s1324_s1 }
  0x16   :  { %p1130_p10 = pnand %p1128_p9, %p1125_p8 }
  0x18   :  { %1133 = shalt.err (!%p1130_p10)
}
  0x19   :  { %s1134_s6 = scalar_lea.vmem %s1202_s15, 12288  ;;  %p1139_p12 = scmp.lt.s32.totalorder %s1202_s15, %s1202_s15 }
  0x1a   :  { %p1135_p11 = scmp.ne.s32.totalorder %s1202_s15, %s1134_s6  ;;  %p1140_p13 = scmp.lt.s32.totalorder %s1134_s6, %s1134_s6 }
  0x1c   :  { %p1141_p0 = por %p1140_p13, %p1139_p12 }
  0x1e   :  { %p1142_p1 = pnand %p1141_p0, %p1135_p11 }
  0x20   :  { %1145 = shalt.err (!%p1142_p1)
}
  0x21   :  { %s1176_s0 = smov 128   ;;  %s1177_s7 = smov 8  }
  0x22   :  { %32 = dma.hbm_to_vmem [thread:$0]  %s1324_s1, 12288, %s1202_s15, [#allocation6], %s1176_s0, %s1176_s0, %s1177_s7  }
  0x23   :  { %1168 = dma.done.wait [#allocation3], 128  }
  0x24   :  { %1169 = vsyncadd [#allocation3], 4294967168 }
  0x25   :  { %1170 = dma.done.wait [#allocation6], 12288  }
  0x26   :  { %1171 = vsyncadd [#allocation6], 4294955008  ;;  %v1178_v0 = vmov 0.0|0.0   ;;  %vm1179_vm0 = vmmov 0   ;;  %v1180_v1 = vmov 0.0   ;;  %v42_v2 = vld [vmem:[#allocation5] sm:$0xff] }
  0x27   :  { %950 = vmatprep.subr.bf16.mxu0 %v1178_v0  ;;  %772 = vmatprep.mubr.msk.f32.mxu0 %vm1179_vm0, %v1180_v1  ;;  %v43_v3 = vld [vmem:[#allocation5 + $0x8] sm:$0xff]  ;;  %v44_v4 = vld [vmem:[#allocation5 + $0x10] sm:$0xff]  ;;  %v45_v6 = vld [vmem:[#allocation5 + $0x18] sm:$0xff]  ;;  %s1181_s21 = smov [#allocation7]  }
  0x28   :  { %974 = vmatprep.subr.bf16.mxu1 %v1178_v0  ;;  %807 = vmatprep.mubr.msk.f32.mxu1 %vm1179_vm0, %v1180_v1  ;;  %v951_v5 = vpack.c.bf16 %v43_v3, %v42_v2  ;;  %v954_v7 = vpack.c.bf16 %v45_v6, %v44_v4  ;;  %v46_v8 = vld [vmem:[#allocation5 + $0x20] sm:$0xff]  ;;  %v47_v9 = vld [vmem:[#allocation5 + $0x28] sm:$0xff]  ;;  %v138_v12 = vld [vmem:[#allocation5 + $0x90] sm:$0xff]  ;;  %s617_s22 = sshll.u32 %s1181_s21, 4  ;;  %s618_s22 = int_to_ptr.vmem [resolvable:$true] %s617_s22 }
  0x29   :  { %v136_v10 = vld [vmem:[#allocation5 + $0x80] sm:$0xff]  ;;  %v137_v11 = vld [vmem:[#allocation5 + $0x88] sm:$0xff]  ;;  %v139_v13 = vld [vmem:[#allocation5 + $0x98] sm:$0xff]  ;;  %v957_v14 = vpack.c.bf16 %v47_v9, %v46_v8  ;;  %s1146_s23 = scalar_lea.vmem %s618_s22, 128  ;;  %p1151_p3 = scmp.lt.s32.totalorder %s618_s22, %s618_s22 }
  0x2a   :  { %952 = vmatpush3.bf16.msra.mxu0 %v951_v5  ;;  %v975_v15 = vpack.c.bf16 %v137_v11, %v136_v10  ;;  %v48_v16 = vld [vmem:[#allocation5 + $0x30] sm:$0xff]  ;;  %v49_v17 = vld [vmem:[#allocation5 + $0x38] sm:$0xff]  ;;  %v978_v18 = vpack.c.bf16 %v139_v13, %v138_v12  ;;  %v140_v19 = vld [vmem:[#allocation5 + $0xa0] sm:$0xff]  ;;  %p1147_p2 = scmp.ne.s32.totalorder %s618_s22, %s1146_s23  ;;  %p1152_p4 = scmp.lt.s32.totalorder %s1146_s23, %s1146_s23 }
  0x2b   :  { %953 = vmatprep.subr.bf16.mxu0 %v1178_v0  ;;  %v141_v20 = vld [vmem:[#allocation5 + $0xa8] sm:$0xff]  ;;  %v960_v21 = vpack.c.bf16 %v49_v17, %v48_v16  ;;  %v50_v22 = vld [vmem:[#allocation5 + $0x40] sm:$0xff]  ;;  %v142_v25 = vld [vmem:[#allocation5 + $0xb0] sm:$0xff] }
  0x2c   :  { %976 = vmatpush3.bf16.msra.mxu1 %v975_v15  ;;  %v51_v23 = vld [vmem:[#allocation5 + $0x48] sm:$0xff]  ;;  %v981_v24 = vpack.c.bf16 %v141_v20, %v140_v19  ;;  %v143_v26 = vld [vmem:[#allocation5 + $0xb8] sm:$0xff]  ;;  %v52_v28 = vld [vmem:[#allocation5 + $0x50] sm:$0xff]  ;;  %p1153_p5 = por %p1152_p4, %p1151_p3 }
  0x2d   :  { %977 = vmatprep.subr.bf16.mxu1 %v1178_v0  ;;  %v963_v27 = vpack.c.bf16 %v51_v23, %v50_v22  ;;  %v53_v29 = vld [vmem:[#allocation5 + $0x58] sm:$0xff]  ;;  %v984_v30 = vpack.c.bf16 %v143_v26, %v142_v25  ;;  %v144_v31 = vld [vmem:[#allocation5 + $0xc0] sm:$0xff]  ;;  %v145_v32 = vld [vmem:[#allocation5 + $0xc8] sm:$0xff] }
  0x2e   :  { %955 = vmatpush3.bf16.msra.mxu0 %v954_v7  ;;  %v966_v33 = vpack.c.bf16 %v53_v29, %v52_v28  ;;  %v54_v34 = vld [vmem:[#allocation5 + $0x60] sm:$0xff]  ;;  %v55_v35 = vld [vmem:[#allocation5 + $0x68] sm:$0xff]  ;;  %v987_v36 = vpack.c.bf16 %v145_v32, %v144_v31  ;;  %v146_v37 = vld [vmem:[#allocation5 + $0xd0] sm:$0xff]  ;;  %p1154_p6 = pnand %p1153_p5, %p1147_p2 }
  0x2f   :  { %956 = vmatprep.subr.bf16.mxu0 %v1178_v0  ;;  %v147_v38 = vld [vmem:[#allocation5 + $0xd8] sm:$0xff]  ;;  %v969_v39 = vpack.c.bf16 %v55_v35, %v54_v34  ;;  %v56_v40 = vld [vmem:[#allocation5 + $0x70] sm:$0xff]  ;;  %v148_v43 = vld [vmem:[#allocation5 + $0xe0] sm:$0xff] }
  0x30   :  { %979 = vmatpush3.bf16.msra.mxu1 %v978_v18  ;;  %v57_v41 = vld [vmem:[#allocation5 + $0x78] sm:$0xff]  ;;  %v990_v42 = vpack.c.bf16 %v147_v38, %v146_v37  ;;  %v149_v44 = vld [vmem:[#allocation5 + $0xe8] sm:$0xff]  ;;  %v150_v48 = vld [vmem:[#allocation5 + $0xf0] sm:$0xff] }
  0x31   :  { %980 = vmatprep.subr.bf16.mxu1 %v1178_v0  ;;  %v972_v45 = vpack.c.bf16 %v57_v41, %v56_v40  ;;  %v993_v46 = vpack.c.bf16 %v149_v44, %v148_v43  ;;  %v41_v47 = vld [vmem:[#allocation2] sm:$0xff]  ;;  %v231_v51 = vld [vmem:[#allocation5 + $0x100] sm:$0xff]  ;;  %v232_v52 = vld [vmem:[#allocation5 + $0x108] sm:$0xff] }
  0x32   :  { %958 = vmatpush3.bf16.msra.mxu0 %v957_v14  ;;  %v151_v49 = vld [vmem:[#allocation5 + $0xf8] sm:$0xff]  ;;  %v233_v53 = vld [vmem:[#allocation5 + $0x110] sm:$0xff]  ;;  %v999_v54 = vpack.c.bf16 %v232_v52, %v231_v51  ;;  %v235_v57 = vld [vmem:[#allocation5 + $0x120] sm:$0xff] }
  0x33   :  { %959 = vmatprep.subr.bf16.mxu0 %v1178_v0  ;;  %v996_v50 = vpack.c.bf16 %v151_v49, %v150_v48  ;;  %v234_v55 = vld [vmem:[#allocation5 + $0x118] sm:$0xff]  ;;  %v236_v58 = vld [vmem:[#allocation5 + $0x128] sm:$0xff]  ;;  %v237_v60 = vld [vmem:[#allocation5 + $0x130] sm:$0xff] }
  0x34   :  { %982 = vmatpush3.bf16.msra.mxu1 %v981_v24  ;;  %v1002_v56 = vpack.c.bf16 %v234_v55, %v233_v53  ;;  %v1005_v59 = vpack.c.bf16 %v236_v58, %v235_v57  ;;  %v238_v61 = vld [vmem:[#allocation5 + $0x138] sm:$0xff]  ;;  %v239_v63 = vld [vmem:[#allocation5 + $0x140] sm:$0xff]  ;;  %v240_v2 = vld [vmem:[#allocation5 + $0x148] sm:$0xff] }
  0x35   :  { %983 = vmatprep.subr.bf16.mxu1 %v1178_v0  ;;  %v1008_v62 = vpack.c.bf16 %v238_v61, %v237_v60  ;;  %v1011_v3 = vpack.c.bf16 %v240_v2, %v239_v63  ;;  %v241_v4 = vld [vmem:[#allocation5 + $0x150] sm:$0xff]  ;;  %v242_v5 = vld [vmem:[#allocation5 + $0x158] sm:$0xff]  ;;  %v243_v7 = vld [vmem:[#allocation5 + $0x160] sm:$0xff] }
  0x36   :  { %961 = vmatpush3.bf16.msra.mxu0 %v960_v21  ;;  %v1014_v6 = vpack.c.bf16 %v242_v5, %v241_v4  ;;  %v244_v8 = vld [vmem:[#allocation5 + $0x168] sm:$0xff]  ;;  %v627_v10 = vld [vmem:[%s1325_s2] ss:$0 sm:$0xff]  ;;  %v245_v14 = vld [vmem:[#allocation5 + $0x170] sm:$0xff] }
  0x37   :  { %962 = vmatprep.subr.bf16.mxu0 %v1178_v0  ;;  %v1017_v9 = vpack.c.bf16 %v244_v8, %v243_v7  ;;  %v246_v15 = vld [vmem:[#allocation5 + $0x178] sm:$0xff]  ;;  %v326_v17 = vld [vmem:[#allocation5 + $0x180] sm:$0xff]  ;;  %v327_v18 = vld [vmem:[#allocation5 + $0x188] sm:$0xff] }
  0x38   :  { %985 = vmatpush3.bf16.msra.mxu1 %v984_v30  ;;  %v1020_v16 = vpack.c.bf16 %v246_v15, %v245_v14  ;;  %v328_v19 = vld [vmem:[#allocation5 + $0x190] sm:$0xff]  ;;  %v1023_v20 = vpack.c.bf16 %v327_v18, %v326_v17  ;;  %v329_v21 = vld [vmem:[#allocation5 + $0x198] sm:$0xff]  ;;  %v330_v23 = vld [vmem:[#allocation5 + $0x1a0] sm:$0xff] }
  0x39   :  { %986 = vmatprep.subr.bf16.mxu1 %v1178_v0  ;;  %v1026_v22 = vpack.c.bf16 %v329_v21, %v328_v19  ;;  %v331_v24 = vld [vmem:[#allocation5 + $0x1a8] sm:$0xff]  ;;  %v332_v26 = vld [vmem:[#allocation5 + $0x1b0] sm:$0xff]  ;;  %v334_v29 = vld [vmem:[#allocation5 + $0x1c0] sm:$0xff] }
  0x3a   :  { %964 = vmatpush3.bf16.msra.mxu0 %v963_v27  ;;  %v1029_v25 = vpack.c.bf16 %v331_v24, %v330_v23  ;;  %v333_v27 = vld [vmem:[#allocation5 + $0x1b8] sm:$0xff]  ;;  %v335_v30 = vld [vmem:[#allocation5 + $0x1c8] sm:$0xff]  ;;  %v336_v32 = vld [vmem:[#allocation5 + $0x1d0] sm:$0xff] }
  0x3b   :  { %965 = vmatprep.subr.bf16.mxu0 %v1178_v0  ;;  %v1032_v28 = vpack.c.bf16 %v333_v27, %v332_v26  ;;  %v1035_v31 = vpack.c.bf16 %v335_v30, %v334_v29  ;;  %v338_v35 = vld [vmem:[#allocation5 + $0x1e0] sm:$0xff]  ;;  %v629_v38 = vld [vmem:[%s1325_s2 + $0x1] ss:$0 sm:$0xff]  ;;  %v426_v52 = vld [vmem:[#allocation5 + $0x228] sm:$0xff] }
  0x3c   :  { %988 = vmatpush3.bf16.msra.mxu1 %v987_v36  ;;  %v339_v36 = vld [vmem:[#allocation5 + $0x1e8] sm:$0xff]  ;;  %v341_v43 = vld [vmem:[#allocation5 + $0x1f8] sm:$0xff]  ;;  %v425_v51 = vld [vmem:[#allocation5 + $0x220] sm:$0xff] }
  0x3d   :  { %989 = vmatprep.subr.bf16.mxu1 %v1178_v0  ;;  %v1041_v37 = vpack.c.bf16 %v339_v36, %v338_v35  ;;  %v424_v49 = vld [vmem:[#allocation5 + $0x218] sm:$0xff]  ;;  %v1053_v53 = vpack.c.bf16 %v426_v52, %v425_v51  ;;  %v429_v57 = vld [vmem:[#allocation5 + $0x240] sm:$0xff]  ;;  %v430_v58 = vld [vmem:[#allocation5 + $0x248] sm:$0xff] }
  0x3e   :  { %967 = vmatpush3.bf16.msra.mxu0 %v966_v33  ;;  %v337_v33 = vld [vmem:[#allocation5 + $0x1d8] sm:$0xff]  ;;  %v431_v60 = vld [vmem:[#allocation5 + $0x250] sm:$0xff]  ;;  %v433_v63 = vld [vmem:[#allocation5 + $0x260] sm:$0xff] }
  0x3f   :  { %968 = vmatprep.subr.bf16.mxu0 %v1178_v0  ;;  %v1038_v34 = vpack.c.bf16 %v337_v33, %v336_v32  ;;  %v428_v55 = vld [vmem:[#allocation5 + $0x238] sm:$0xff]  ;;  %v434_v2 = vld [vmem:[#allocation5 + $0x268] sm:$0xff]  ;;  %v435_v8 = vld [vmem:[#allocation5 + $0x270] sm:$0xff] }
  0x40   :  { %991 = vmatpush3.bf16.msra.mxu1 %v990_v42  ;;  %v340_v42 = vld [vmem:[#allocation5 + $0x1f0] sm:$0xff]  ;;  %v432_v61 = vld [vmem:[#allocation5 + $0x258] sm:$0xff]  ;;  %v520_v17 = vld [vmem:[#allocation5 + $0x2a0] sm:$0xff] }
  0x41   :  { %992 = vmatprep.subr.bf16.mxu1 %v1178_v0  ;;  %v1044_v44 = vpack.c.bf16 %v341_v43, %v340_v42  ;;  %v631_v4 = vld [vmem:[%s1325_s2 + $0x2] ss:$0 sm:$0xff]  ;;  %v521_v18 = vld [vmem:[#allocation5 + $0x2a8] sm:$0xff]  ;;  %v530_v35 = vld [vmem:[#allocation5 + $0x2f0] sm:$0xff] }
  0x42   :  { %970 = vmatpush3.bf16.msra.mxu0 %v969_v39  ;;  %v519_v15 = vld [vmem:[#allocation5 + $0x298] sm:$0xff]  ;;  %v1077_v19 = vpack.c.bf16 %v521_v18, %v520_v17  ;;  %v525_v23 = vld [vmem:[#allocation5 + $0x2c8] sm:$0xff] }
  0x43   :  { %971 = vmatprep.subr.bf16.mxu0 %v1178_v0  ;;  %v527_v26 = vld [vmem:[#allocation5 + $0x2d8] sm:$0xff]  ;;  %v529_v29 = vld [vmem:[#allocation5 + $0x2e8] sm:$0xff] }
  0x44   :  { %994 = vmatpush3.bf16.msra.mxu1 %v993_v46  ;;  %v422_v46 = vld [vmem:[#allocation5 + $0x208] sm:$0xff]  ;;  %v531_v36 = vld [vmem:[#allocation5 + $0x2f8] sm:$0xff] }
  0x45   :  { %995 = vmatprep.subr.bf16.mxu1 %v1178_v0 }
  0x46   :  { %973 = vmatpush3.bf16.msra.mxu0 %v972_v45  ;;  %v421_v45 = vld [vmem:[#allocation5 + $0x200] sm:$0xff] }
  0x47   :  { %998 = vmatprep.subr.bf16.mxu0 %v1178_v0  ;;  %v1047_v48 = vpack.c.bf16 %v422_v46, %v421_v45 }
  0x48   :  { %997 = vmatpush3.bf16.msra.mxu1 %v996_v50 }
  0x49   :  { %773 = vmatmul.mubr.f32.vlgmr.msra.gmra.mrb[0].mxu0 %v41_v47  ;;  %1022 = vmatprep.subr.bf16.mxu1 %v1178_v0  ;;  %v423_v47 = vld [vmem:[#allocation5 + $0x210] sm:$0xff] }
  0x4a   :  { %842 = vmatprep.mubr.msk.f32.mxu0 %vm1179_vm0, %v1180_v1  ;;  %1000 = vmatpush3.bf16.msra.mxu0 %v999_v54  ;;  %v1050_v50 = vpack.c.bf16 %v424_v49, %v423_v47  ;;  %v427_v54 = vld [vmem:[#allocation5 + $0x230] sm:$0xff] }
  0x4b   :  { %1001 = vmatprep.subr.bf16.mxu0 %v1178_v0 }
  0x4e   :  { %1003 = vmatpush3.bf16.msra.mxu0 %v1002_v56  ;;  %v1056_v56 = vpack.c.bf16 %v428_v55, %v427_v54 }
  0x4f   :  { %1004 = vmatprep.subr.bf16.mxu0 %v1178_v0 }
  0x52   :  { %1006 = vmatpush3.bf16.msra.mxu0 %v1005_v59  ;;  %v1059_v59 = vpack.c.bf16 %v430_v58, %v429_v57 }
  0x53   :  { %1007 = vmatprep.subr.bf16.mxu0 %v1178_v0 }
  0x56   :  { %1009 = vmatpush3.bf16.msra.mxu0 %v1008_v62  ;;  %v1062_v62 = vpack.c.bf16 %v432_v61, %v431_v60 }
  0x57   :  { %1010 = vmatprep.subr.bf16.mxu0 %v1178_v0 }
  0x5a   :  { %1012 = vmatpush3.bf16.msra.mxu0 %v1011_v3  ;;  %v1065_v3 = vpack.c.bf16 %v434_v2, %v433_v63 }
  0x5b   :  { %1013 = vmatprep.subr.bf16.mxu0 %v1178_v0 }
  0x5e   :  { %1015 = vmatpush3.bf16.msra.mxu0 %v1014_v6 }
  0x5f   :  { %1016 = vmatprep.subr.bf16.mxu0 %v1178_v0 }
  0x62   :  { %1018 = vmatpush3.bf16.msra.mxu0 %v1017_v9  ;;  %v436_v9 = vld [vmem:[#allocation5 + $0x278] sm:$0xff] }
  0x63   :  { %1019 = vmatprep.subr.bf16.mxu0 %v1178_v0 }
  0x66   :  { %1021 = vmatpush3.bf16.msra.mxu0 %v1020_v16 }
  0x67   :  { %1046 = vmatprep.subr.bf16.mxu0 %v1178_v0 }
 0x11c   :  { %v131_v11 = vpop.f32.mrb[0].mxu0 }
 0x11d   :  { %v132_v12 = vadd.f32 %v627_v10, %v131_v11  ;;  %v774_v13 = vpop.f32.mrb[1].mxu0  ;;  %v1068_v10 = vpack.c.bf16 %v436_v9, %v435_v8  ;;  %v516_v11 = vld [vmem:[#allocation5 + $0x280] sm:$0xff] }
 0x11e   :  { %v518_v13 = vld [vmem:[#allocation5 + $0x290] sm:$0xff] }
 0x11f   :  { %808 = vmatmul.mubr.f32.vlgmr.msra.gmra.mrb[0].mxu1 %v132_v12  ;;  %v517_v12 = vld [vmem:[#allocation5 + $0x288] sm:$0xff]  ;;  %v1074_v16 = vpack.c.bf16 %v519_v15, %v518_v13 }
 0x120   :  { %877 = vmatprep.mubr.msk.f32.mxu1 %vm1179_vm0, %v1180_v1  ;;  %1024 = vmatpush3.bf16.msra.mxu1 %v1023_v20  ;;  %v1071_v14 = vpack.c.bf16 %v517_v12, %v516_v11  ;;  %v523_v20 = vld [vmem:[#allocation5 + $0x2b8] sm:$0xff] }
 0x121   :  { %1025 = vmatprep.subr.bf16.mxu1 %v1178_v0 }
 0x124   :  { %1027 = vmatpush3.bf16.msra.mxu1 %v1026_v22  ;;  %v524_v22 = vld [vmem:[#allocation5 + $0x2c0] sm:$0xff] }
 0x125   :  { %1028 = vmatprep.subr.bf16.mxu1 %v1178_v0  ;;  %v1083_v24 = vpack.c.bf16 %v525_v23, %v524_v22 }
 0x128   :  { %1030 = vmatpush3.bf16.msra.mxu1 %v1029_v25  ;;  %v526_v25 = vld [vmem:[#allocation5 + $0x2d0] sm:$0xff] }
 0x129   :  { %1031 = vmatprep.subr.bf16.mxu1 %v1178_v0  ;;  %v1086_v27 = vpack.c.bf16 %v527_v26, %v526_v25 }
 0x12c   :  { %1033 = vmatpush3.bf16.msra.mxu1 %v1032_v28  ;;  %v528_v28 = vld [vmem:[#allocation5 + $0x2e0] sm:$0xff] }
 0x12d   :  { %1034 = vmatprep.subr.bf16.mxu1 %v1178_v0  ;;  %v1089_v30 = vpack.c.bf16 %v529_v29, %v528_v28 }
 0x130   :  { %1036 = vmatpush3.bf16.msra.mxu1 %v1035_v31  ;;  %v633_v31 = vld [vmem:[%s1325_s2 + $0x3] ss:$0 sm:$0xff] }
 0x131   :  { %1037 = vmatprep.subr.bf16.mxu1 %v1178_v0 }
 0x134   :  { %1039 = vmatpush3.bf16.msra.mxu1 %v1038_v34 }
 0x135   :  { %1040 = vmatprep.subr.bf16.mxu1 %v1178_v0 }
 0x138   :  { %1042 = vmatpush3.bf16.msra.mxu1 %v1041_v37  ;;  %v1092_v37 = vpack.c.bf16 %v531_v36, %v530_v35 }
 0x139   :  { %1043 = vmatprep.subr.bf16.mxu1 %v1178_v0 }
 0x13c   :  { %1045 = vmatpush3.bf16.msra.mxu1 %v1044_v44 }
 0x13d   :  { %1070 = vmatprep.subr.bf16.mxu1 %v1178_v0 }
 0x1f2   :  { %v226_v39 = vpop.f32.mrb[0].mxu1 }
 0x1f3   :  { %v227_v40 = vadd.f32 %v629_v38, %v226_v39  ;;  %v809_v41 = vpop.f32.mrb[1].mxu1  ;;  %v635_v38 = vld [vmem:[%s1325_s2 + $0x4] ss:$0 sm:$0xff] }
 0x1f5   :  { %843 = vmatmul.mubr.f32.vlgmr.msra.gmra.mrb[2].mxu0 %v227_v40 }
 0x1f6   :  { %912 = vmatprep.mubr.msk.f32.mxu0 %vm1179_vm0, %v1180_v1  ;;  %1048 = vmatpush3.bf16.msra.mxu0 %v1047_v48 }
 0x1f7   :  { %1049 = vmatprep.subr.bf16.mxu0 %v1178_v0 }
 0x1fa   :  { %1051 = vmatpush3.bf16.msra.mxu0 %v1050_v50 }
 0x1fb   :  { %1052 = vmatprep.subr.bf16.mxu0 %v1178_v0 }
 0x1fe   :  { %1054 = vmatpush3.bf16.msra.mxu0 %v1053_v53 }
 0x1ff   :  { %1055 = vmatprep.subr.bf16.mxu0 %v1178_v0 }
 0x202   :  { %1057 = vmatpush3.bf16.msra.mxu0 %v1056_v56 }
 0x203   :  { %1058 = vmatprep.subr.bf16.mxu0 %v1178_v0 }
 0x206   :  { %1060 = vmatpush3.bf16.msra.mxu0 %v1059_v59 }
 0x207   :  { %1061 = vmatprep.subr.bf16.mxu0 %v1178_v0 }
 0x20a   :  { %1063 = vmatpush3.bf16.msra.mxu0 %v1062_v62 }
 0x20b   :  { %1064 = vmatprep.subr.bf16.mxu0 %v1178_v0 }
 0x20e   :  { %1066 = vmatpush3.bf16.msra.mxu0 %v1065_v3 }
 0x20f   :  { %1067 = vmatprep.subr.bf16.mxu0 %v1178_v0 }
 0x212   :  { %1069 = vmatpush3.bf16.msra.mxu0 %v1068_v10 }
 0x2c8   :  { %v321_v5 = vpop.f32.mrb[2].mxu0 }
 0x2c9   :  { %v322_v6 = vadd.f32 %v631_v4, %v321_v5  ;;  %v844_v7 = vpop.f32.mrb[3].mxu0 }
 0x2cb   :  { %878 = vmatmul.mubr.f32.vlgmr.msra.gmra.mrb[2].mxu1 %v322_v6 }
 0x2cc   :  { %947 = vmatprep.mubr.msk.f32.mxu1 %vm1179_vm0, %v1180_v1  ;;  %1072 = vmatpush3.bf16.msra.mxu1 %v1071_v14  ;;  %v522_v1 = vld [vmem:[#allocation5 + $0x2b0] sm:$0xff] }
 0x2cd   :  { %1073 = vmatprep.subr.bf16.mxu1 %v1178_v0  ;;  %v1080_v21 = vpack.c.bf16 %v523_v20, %v522_v1 }
 0x2d0   :  { %1075 = vmatpush3.bf16.msra.mxu1 %v1074_v16 }
 0x2d1   :  { %1076 = vmatprep.subr.bf16.mxu1 %v1178_v0 }
 0x2d4   :  { %1078 = vmatpush3.bf16.msra.mxu1 %v1077_v19 }
 0x2d5   :  { %1079 = vmatprep.subr.bf16.mxu1 %v1178_v0 }
 0x2d8   :  { %1081 = vmatpush3.bf16.msra.mxu1 %v1080_v21 }
 0x2d9   :  { %1082 = vmatprep.subr.bf16.mxu1 %v1178_v0 }
 0x2dc   :  { %1084 = vmatpush3.bf16.msra.mxu1 %v1083_v24 }
 0x2dd   :  { %1085 = vmatprep.subr.bf16.mxu1 %v1178_v0 }
 0x2e0   :  { %1087 = vmatpush3.bf16.msra.mxu1 %v1086_v27 }
 0x2e1   :  { %1088 = vmatprep.subr.bf16.mxu1 %v1178_v0 }
 0x2e4   :  { %1090 = vmatpush3.bf16.msra.mxu1 %v1089_v30 }
 0x2e5   :  { %1091 = vmatprep.subr.bf16.mxu1 %v1178_v0  ;;  %v637_v0 = vld [vmem:[%s1325_s2 + $0x5] ss:$0 sm:$0xff] }
 0x2e8   :  { %1093 = vmatpush3.bf16.msra.mxu1 %v1092_v37 }
 0x39e   :  { %v416_v32 = vpop.f32.mrb[2].mxu1 }
 0x39f   :  { %v417_v33 = vadd.f32 %v633_v31, %v416_v32  ;;  %v879_v34 = vpop.f32.mrb[3].mxu1 }
 0x3a1   :  { %913 = vmatmul.mubr.f32.vlgmr.msra.gmra.mrb[4].mxu0 %v417_v33 }
 0x474   :  { %v511_v39 = vpop.f32.mrb[4].mxu0 }
 0x475   :  { %v512_v40 = vadd.f32 %v635_v38, %v511_v39  ;;  %v914_v41 = vpop.f32.mrb[5].mxu0 }
 0x477   :  { %948 = vmatmul.mubr.f32.vlgmr.msra.gmra.mrb[4].mxu1 %v512_v40 }
 0x54a   :  { %v606_v42 = vpop.f32.mrb[4].mxu1 }
 0x54b   :  { %v607_v43 = vadd.f32 %v637_v0, %v606_v42  ;;  %v949_v44 = vpop.f32.mrb[5].mxu1 }
 0x54d   :  { %610 = vst [vmem:[#allocation7] sm:$0xff] %v607_v43 }
 0x54e   :  { %1157 = shalt.err (!%p1154_p6)
}
 0x54f   :  { %s1158_s26 = scalar_lea.hbm %s1326_s3, 128 }
 0x550   :  { %p1159_p7 = scmp.ne.s32.totalorder %s1326_s3, %s1158_s26  ;;  %p1162_p8 = scmp.lt.u32.totalorder %s1158_s26, %s1326_s3 }
 0x552   :  { %p1164_p9 = pnand %p1162_p8, %p1159_p7 }
 0x554   :  { %1167 = shalt.err (!%p1164_p9)
}
 0x555   :  { %620 = dma.vmem_to_hbm [thread:$0]  %s618_s22, 128, %s1326_s3, [#allocation4]  }
 0x556   :  { %1172 = dma.done.wait [#allocation4], 128  }
 0x557   :  { %1173 = vsyncadd [#allocation4], 4294967168 }
 0x558   :  { %624 = vsyncpa [#allocation3], 1 }
 0x559   :  { %625 = vsyncpa [#allocation6], 1 }
 0x55a   :  { %626 = vsyncpa [#allocation4], 1 }

</bundles_post_ra>
